<compile_context>
chip_gen: v6e
topology: v6e:2x2x1
jax: 0.10.0
libtpu: 0.0.40
codegen_flags: <defaults>
</compile_context>

<pallas_src>
import jax
import jax.numpy as jnp
from jax.experimental import pallas as pl
from jax.experimental.pallas import tpu as pltpu


def _round_up(x, m):
    return ((x + m - 1) // m) * m


def _fault_locator_kernel(xp_ref, w1p_ref, b1p_ref, w2p_ref, b2_ref, o_ref):
    # xp_ref : [tile_p, p*e]  p original rows packed per lane-dense row (streamed)
    # w1p_ref: [p*e, p*16]    block-diagonal fc1 weights (resident)
    # b1p_ref: [1, p*16]      fc1 bias with test-vector term folded in, tiled p times
    # w2p_ref: [p*16, p]      block-diagonal fc2 weight column
    # b2_ref : [1, 1]         fc2 bias
    # o_ref  : [tile_p, p]    sigmoid scores; (row k, lane i) == original row p*k + i
    h = jnp.dot(xp_ref[...], w1p_ref[...], preferred_element_type=jnp.float32)
    h = jnp.maximum(h + b1p_ref[...], 0.0)                               # fc1 + ReLU
    y = jnp.dot(h, w2p_ref[...], preferred_element_type=jnp.float32) + b2_ref[...]
    o_ref[...] = jax.nn.sigmoid(y).astype(o_ref.dtype)                   # fc2 + sigmoid


def fault_locator(func_emb, test_vec, w1, b1, w2, b2, *, tile_rows=32768):
    """func_emb: [N, E], test_vec: [T] -> [N] float32 sigmoid scores.

    Parameters are stored transposed w.r.t. PyTorch:
      w1: [E+T, 16] (= fc1.weight.T), b1: [16], w2: [16, 1] (= fc2.weight.T), b2: [1]
    """
    n, e = func_emb.shape
    t = test_vec.shape[0]
    assert w1.shape == (e + t, 16) and w2.shape == (16, 1)

    # Fold the constant test-vector contribution into the fc1 bias (kernel never
    # sees the concatenated [N, E+T] activation).
    w1 = w1.astype(jnp.float32)
    b1_fused = test_vec.astype(jnp.float32) @ w1[e:, :] + b1.astype(jnp.float32)  # [16]
    w1_emb = w1[:e, :]                                                             # [E,16]
    w2 = w2.astype(jnp.float32)
    b2 = b2.astype(jnp.float32)

    # ---- lane-dense packing: p original rows per 128-lane slab -----------------
    x = func_emb                              # native dtype, no wrapper astype copy
    p = 128 // e if (e <= 128 and 128 % e == 0) else 1
    if p > 1:
        rem = n % p
        if rem:
            # pad at most p-1 rows so the (otherwise free) contiguous reshape is valid
            x = jnp.concatenate([x, jnp.zeros((p - rem, e), dtype=x.dtype)], axis=0)
        xp = x.reshape(-1, p * e)             # [N/p, 128], free row-major reshape
    else:
        xp = x                                # fallback: unpacked [N, E]
    rows_p = xp.shape[0]

    # Block-diagonal packed parameters (tiny; built once per call).
    eye = jnp.eye(p, dtype=jnp.float32)
    w1p = jnp.kron(eye, w1_emb)               # [p*e, p*16]
    w2p = jnp.kron(eye, w2)                   # [p*16, p]
    b1p = jnp.tile(b1_fused, p).reshape(1, p * 16)
    b2p = b2.reshape(1, 1)
    if xp.dtype == jnp.bfloat16:              # stream bf16 natively into the MXU
        w1p = w1p.astype(jnp.bfloat16)

    # ---- tiling: big tiles amortize per-grid-step overhead ---------------------
    itemsize = int(jnp.dtype(xp.dtype).itemsize)
    tile_p = _round_up(max(32, tile_rows // p), 32)   # 32 covers f32/bf16/int8 sublanes
    tile_p = min(tile_p, 16384)                       # keep each buffer <= ~8 MiB
    if rows_p <= tile_p:
        half = _round_up(pl.cdiv(rows_p, 2), 32)
        if rows_p >= 2048 and half < rows_p:
            tile_p = half                             # >=2 tiles so v7x megacore engages
        else:
            tile_p = rows_p                           # single full-array block
    num_tiles = pl.cdiv(rows_p, tile_p)               # ragged last tile is fine

    lane_in = _round_up(p * e, 128)
    in_buf = tile_p * lane_in * itemsize
    out_buf = tile_p * 128 * 4                         # p output lanes padded to 128
    vmem_limit = int(min(max(2 * (in_buf + out_buf) + (2 << 20), 16 << 20), 48 << 20))

    cost = pl.CostEstimate(
        flops=2 * n * 16 * (e + t + 1),
        transcendentals=n,
        bytes_accessed=int(n * e * itemsize + n * 4 + (e + t) * 16 * 4),
    )

    out = pl.pallas_call(
        _fault_locator_kernel,
        out_shape=jax.ShapeDtypeStruct((rows_p, p), jnp.float32),
        grid=(num_tiles,),
        in_specs=[
            pl.BlockSpec((tile_p, p * e), lambda i: (i, 0)),    # streamed input slab
            pl.BlockSpec((p * e, p * 16), lambda i: (0, 0)),    # resident parameters
            pl.BlockSpec((1, p * 16), lambda i: (0, 0)),
            pl.BlockSpec((p * 16, p), lambda i: (0, 0)),
            pl.BlockSpec((1, 1), lambda i: (0, 0)),
        ],
        out_specs=pl.BlockSpec((tile_p, p), lambda i: (i, 0)),
        compiler_params=pltpu.CompilerParams(
            dimension_semantics=("parallel",),                   # pays off on v7x (2 TCs)
            vmem_limit_bytes=vmem_limit,
        ),
        cost_estimate=cost,
    )(xp, w1p, b1p, w2p, b2p)

    # Packed (row k, lane i) == original row p*k + i, so row-major flatten is correct.
    return out.reshape(-1)[:n]


def init_params(key, embed_size, test_case_size):
    """Deterministic synthetic params matching nn.Linear shapes (stored transposed)."""
    d = embed_size + test_case_size
    k1, k2, k3, k4 = jax.random.split(key, 4)
    bound1 = 1.0 / jnp.sqrt(d)
    w1 = jax.random.uniform(k1, (d, 16), jnp.float32, -bound1, bound1)
    b1 = jax.random.uniform(k2, (16,), jnp.float32, -bound1, bound1)
    bound2 = 1.0 / jnp.sqrt(16.0)
    w2 = jax.random.uniform(k3, (16, 1), jnp.float32, -bound2, bound2)
    b2 = jax.random.uniform(k4, (1,), jnp.float32, -bound2, bound2)
    return w1, b1, w2, b2


def reference(func_emb, test_vec, w1, b1, w2, b2):
    n = func_emb.shape[0]
    x = jnp.concatenate(
        [func_emb, jnp.broadcast_to(test_vec, (n, test_vec.shape[0]))], axis=1)
    h = jnp.maximum(x @ w1 + b1, 0.0)
    return jax.nn.sigmoid(h @ w2 + b2).reshape(n)


if __name__ == "__main__":
    embed_size = 32
    test_case_size = 16
    n_funcs = 8

    key = jax.random.PRNGKey(0)
    kp, ke, kt = jax.random.split(key, 3)
    w1, b1, w2, b2 = init_params(kp, embed_size, test_case_size)

    func_emb = jax.random.normal(ke, (n_funcs, embed_size), jnp.float32)
    test_vec = jax.random.normal(kt, (test_case_size,), jnp.float32)

    out = fault_locator(func_emb, test_vec, w1, b1, w2, b2)
    out = jax.block_until_ready(out)
    ref = reference(func_emb, test_vec, w1, b1, w2, b2)
    assert out.shape == (n_funcs,)
    assert jnp.allclose(out, ref, atol=1e-5, rtol=1e-5)

    # Secondary check: multi-tile grid with a ragged last block (still small: 512 KiB).
    n2 = 4100
    func_emb2 = jax.random.normal(ke, (n2, embed_size), jnp.float32)
    out2 = jax.block_until_ready(
        fault_locator(func_emb2, test_vec, w1, b1, w2, b2, tile_rows=1024))
    ref2 = reference(func_emb2, test_vec, w1, b1, w2, b2)
    assert out2.shape == (n2,)
    assert jnp.allclose(out2, ref2, atol=1e-5, rtol=1e-5)

    print("KERNEL_OK")
</pallas_src>

<mosaic_0001>
module attributes {stable_mosaic.version = 11 : i64} {
  func.func @_fault_locator_kernel(%arg0: i32, %arg1: memref<2x128xf32, #tpu.memory_space<vmem>>, %arg2: memref<128x64xf32, #tpu.memory_space<vmem>>, %arg3: memref<1x64xf32, #tpu.memory_space<vmem>>, %arg4: memref<64x4xf32, #tpu.memory_space<vmem>>, %arg5: memref<1x1xf32, #tpu.memory_space<vmem>>, %arg6: memref<2x4xf32, #tpu.memory_space<vmem>>) attributes {dimension_semantics = [#tpu.dimension_semantics<parallel>], iteration_bounds = array<i64: 1>, scalar_prefetch = 0 : i64, scratch_operands = 0 : i64, tpu.core_type = #tpu.core_type<tc>, window_params = [{transform_indices = @transform_0, window_bounds = array<i64: 2, 128>}, {pipeline_mode = #tpu.pipeline_mode<synchronous>, transform_indices = @transform_1, window_bounds = array<i64: 128, 64>}, {pipeline_mode = #tpu.pipeline_mode<synchronous>, transform_indices = @transform_2, window_bounds = array<i64: 1, 64>}, {pipeline_mode = #tpu.pipeline_mode<synchronous>, transform_indices = @transform_3, window_bounds = array<i64: 64, 4>}, {pipeline_mode = #tpu.pipeline_mode<synchronous>, transform_indices = @transform_4, window_bounds = array<i64: 1, 1>}, {transform_indices = @transform_5, window_bounds = array<i64: 2, 4>}]} {
    %c0 = arith.constant 0 : index
    %c0_0 = arith.constant 0 : index
    %0 = vector.load %arg1[%c0, %c0_0] : memref<2x128xf32, #tpu.memory_space<vmem>>, vector<2x128xf32>
    %c0_1 = arith.constant 0 : index
    %c0_2 = arith.constant 0 : index
    %1 = vector.load %arg2[%c0_1, %c0_2] : memref<128x64xf32, #tpu.memory_space<vmem>>, vector<128x64xf32>
    %cst = arith.constant dense<0.000000e+00> : vector<2x64xf32>
    %2 = tpu.matmul %0, %1, %cst {dimension_numbers = #tpu.dot_dimension_numbers<[1], [0], [0], [1], [0, 0, 1, 1], [], []>} : vector<2x128xf32>, vector<128x64xf32>, vector<2x64xf32> -> vector<2x64xf32>
    %c0_3 = arith.constant 0 : index
    %c0_4 = arith.constant 0 : index
    %3 = vector.load %arg3[%c0_3, %c0_4] : memref<1x64xf32, #tpu.memory_space<vmem>>, vector<1x64xf32>
    %4 = vector.broadcast %3 : vector<1x64xf32> to vector<2x64xf32>
    %5 = arith.addf %2, %4 : vector<2x64xf32>
    %cst_5 = arith.constant 0.000000e+00 : f32
    %6 = vector.broadcast %cst_5 : f32 to vector<2x64xf32>
    %7 = arith.maximumf %5, %6 : vector<2x64xf32>
    %c0_6 = arith.constant 0 : index
    %c0_7 = arith.constant 0 : index
    %8 = vector.load %arg4[%c0_6, %c0_7] : memref<64x4xf32, #tpu.memory_space<vmem>>, vector<64x4xf32>
    %cst_8 = arith.constant dense<0.000000e+00> : vector<2x4xf32>
    %9 = tpu.matmul %7, %8, %cst_8 {dimension_numbers = #tpu.dot_dimension_numbers<[1], [0], [0], [1], [0, 0, 1, 1], [], []>} : vector<2x64xf32>, vector<64x4xf32>, vector<2x4xf32> -> vector<2x4xf32>
    %c0_9 = arith.constant 0 : index
    %c0_10 = arith.constant 0 : index
    %10 = vector.load %arg5[%c0_9, %c0_10] : memref<1x1xf32, #tpu.memory_space<vmem>>, vector<1x1xf32>
    %11 = vector.broadcast %10 : vector<1x1xf32> to vector<2x4xf32>
    %12 = arith.addf %9, %11 : vector<2x4xf32>
    %13 = arith.negf %12 : vector<2x4xf32>
    %14 = math.exp %13 : vector<2x4xf32>
    %cst_11 = arith.constant 1.000000e+00 : f32
    %15 = vector.broadcast %cst_11 : f32 to vector<2x4xf32>
    %16 = arith.addf %15, %14 : vector<2x4xf32>
    %17 = arith.divf %15, %16 : vector<2x4xf32>
    %c0_12 = arith.constant 0 : index
    %c0_13 = arith.constant 0 : index
    %18 = vector.load %arg6[%c0_12, %c0_13] : memref<2x4xf32, #tpu.memory_space<vmem>>, vector<2x4xf32>
    tpu.vector_store %arg6[%c0_12, %c0_13], %17 {strides = array<i32>} : memref<2x4xf32, #tpu.memory_space<vmem>>, vector<2x4xf32>,
    return
  }
  func.func @transform_0(%arg0: i32) -> (i32, i32) {
    %c0_i32 = arith.constant 0 : i32
    %c0_i32_0 = arith.constant 0 : i32
    return %arg0, %c0_i32 : i32, i32
  }
  func.func @transform_1(%arg0: i32) -> (i32, i32) {
    %c0_i32 = arith.constant 0 : i32
    %c0_i32_0 = arith.constant 0 : i32
    %c0_i32_1 = arith.constant 0 : i32
    return %c0_i32, %c0_i32_0 : i32, i32
  }
  func.func @transform_2(%arg0: i32) -> (i32, i32) {
    %c0_i32 = arith.constant 0 : i32
    %c0_i32_0 = arith.constant 0 : i32
    %c0_i32_1 = arith.constant 0 : i32
    return %c0_i32, %c0_i32_0 : i32, i32
  }
  func.func @transform_3(%arg0: i32) -> (i32, i32) {
    %c0_i32 = arith.constant 0 : i32
    %c0_i32_0 = arith.constant 0 : i32
    %c0_i32_1 = arith.constant 0 : i32
    return %c0_i32, %c0_i32_0 : i32, i32
  }
  func.func @transform_4(%arg0: i32) -> (i32, i32) {
    %c0_i32 = arith.constant 0 : i32
    %c0_i32_0 = arith.constant 0 : i32
    %c0_i32_1 = arith.constant 0 : i32
    return %c0_i32, %c0_i32_0 : i32, i32
  }
  func.func @transform_5(%arg0: i32) -> (i32, i32) {
    %c0_i32 = arith.constant 0 : i32
    %c0_i32_0 = arith.constant 0 : i32
    return %arg0, %c0_i32 : i32, i32
  }
}

</mosaic_0001>

<bundles_post_ra>
// kernel: tpu_custom_call.1
= control target key start
LH: loop header
LB: loop body
LE: loop exit
PB: predicated region body
PF: predicated region fallthrough
CT: control target
= control target key end

     0   :  { %s491_s0 = inlined_call_operand.vmem [shape: f32[2,128], index: 0, kind: input, shape index: {}]   ;;  %s492_s1 = inlined_call_operand.vmem [shape: f32[128,64], index: 1, kind: input, shape index: {}]   ;;  %s493_s2 = inlined_call_operand.vmem [shape: f32[1,64], index: 2, kind: input, shape index: {}]   ;;  %s494_s3 = inlined_call_operand.vmem [shape: f32[64,4], index: 3, kind: input, shape index: {}]   ;;  %s495_s4 = inlined_call_operand.<no memory space> [shape: f32[1,1], index: 4, kind: input, shape index: {}]   ;;  %s496_s5 = inlined_call_operand.hbm [shape: f32[2,4], index: 5, kind: output, shape index: {}]  }
   0x1   :  { %v10_v0 = vstv %s495_s4 }
   0x2   :  { %11 = vst [vmem:[#allocation2] sm:$0x1] %v10_v0 }
   0x3   :  { %v39_v1 = vld [vmem:[%s492_s1 + $0x78] sm:$0xff]  ;;  %v347_v2 = vmov 0.0   ;;  %v38_v3 = vld [vmem:[%s492_s1 + $0x70] sm:$0xff]  ;;  %vm348_vm0 = vmmov 0   ;;  %v37_v4 = vld [vmem:[%s492_s1 + $0x68] sm:$0xff] }
   0x4   :  { %262 = vmatprep.subr.mxu0 %v347_v2  ;;  %294 = vmatprep.mubr.msk.f32.mxu0 %vm348_vm0, %v347_v2  ;;  %v36_v5 = vld [vmem:[%s492_s1 + $0x60] sm:$0xff]  ;;  %v125_v6 = vld [vmem:[%s494_s3 + $0x38] sm:$0xff]  ;;  %v124_v7 = vld [vmem:[%s494_s3 + $0x30] sm:$0xff] }
   0x5   :  { %263 = vmatpush3.msra.mxu0 %v39_v1  ;;  %297 = vmatprep.subr.mxu1 %v347_v2  ;;  %v35_v8 = vld [vmem:[%s492_s1 + $0x58] sm:$0xff]  ;;  %v123_v9 = vld [vmem:[%s494_s3 + $0x28] sm:$0xff] }
   0x6   :  { %264 = vmatprep.subr.mxu0 %v347_v2  ;;  %313 = vmatprep.mubr.msk.f32.mxu1 %vm348_vm0, %v347_v2 }
   0x7   :  { %265 = vmatpush3.msra.mxu0 %v38_v3  ;;  %298 = vmatpush3.msra.mxu1 %v125_v6 }
   0x8   :  { %266 = vmatprep.subr.mxu0 %v347_v2  ;;  %299 = vmatprep.subr.mxu1 %v347_v2 }
   0x9   :  { %267 = vmatpush3.msra.mxu0 %v37_v4 }
   0xa   :  { %268 = vmatprep.subr.mxu0 %v347_v2 }
   0xb   :  { %12 = vsyncpa [#allocation4], 0  ;;  %269 = vmatpush3.msra.mxu0 %v36_v5  ;;  %300 = vmatpush3.msra.mxu1 %v124_v7  ;;  %v34_v10 = vld [vmem:[%s492_s1 + $0x50] sm:$0xff]  ;;  %v122_v11 = vld [vmem:[%s494_s3 + $0x20] sm:$0xff]  ;;  %v349_v28 = vmov 0   ;;  %vm136_vm1 = vcmask 523264  }
   0xc   :  { %270 = vmatprep.subr.mxu0 %v347_v2  ;;  %301 = vmatprep.subr.mxu1 %v347_v2  ;;  %v33_v12 = vld [vmem:[%s492_s1 + $0x48] sm:$0xff]  ;;  %v121_v13 = vld [vmem:[%s494_s3 + $0x18] sm:$0xff]  ;;  %v32_v14 = vld [vmem:[%s492_s1 + $0x40] sm:$0xff]  ;;  %vm216_vm2 = vcmask 25600  }
   0xd   :  { %271 = vmatpush3.msra.mxu0 %v35_v8  ;;  %302 = vmatpush3.msra.mxu1 %v123_v9  ;;  %v31_v15 = vld [vmem:[%s492_s1 + $0x38] sm:$0xff]  ;;  %v30_v16 = vld [vmem:[%s492_s1 + $0x30] sm:$0xff]  ;;  %v29_v17 = vld [vmem:[%s492_s1 + $0x28] sm:$0xff] }
   0xe   :  { %272 = vmatprep.subr.mxu0 %v347_v2  ;;  %303 = vmatprep.subr.mxu1 %v347_v2  ;;  %v28_v18 = vld [vmem:[%s492_s1 + $0x20] sm:$0xff]  ;;  %v27_v19 = vld [vmem:[%s492_s1 + $0x18] sm:$0xff]  ;;  %v26_v20 = vld [vmem:[%s492_s1 + $0x10] sm:$0xff] }
   0xf   :  { %273 = vmatpush3.msra.mxu0 %v34_v10  ;;  %304 = vmatpush3.msra.mxu1 %v122_v11  ;;  %v25_v21 = vld [vmem:[%s492_s1 + $0x8] sm:$0xff]  ;;  %v24_v22 = vld [vmem:[%s492_s1] sm:$0xff]  ;;  %v120_v24 = vld [vmem:[%s494_s3 + $0x10] sm:$0xff] }
  0x10   :  { %274 = vmatprep.subr.mxu0 %v347_v2  ;;  %305 = vmatprep.subr.mxu1 %v347_v2  ;;  %v23_v23 = vld [vmem:[%s491_s0] sm:$0x3]  ;;  %v119_v25 = vld [vmem:[%s494_s3 + $0x8] sm:$0xff] }
  0x11   :  { %275 = vmatpush3.msra.mxu0 %v33_v12  ;;  %306 = vmatpush3.msra.mxu1 %v121_v13  ;;  %v118_v26 = vld [vmem:[%s494_s3] sm:$0xff]  ;;  %s350_s3 = smov [#allocation3]  }
  0x12   :  { %276 = vmatprep.subr.mxu0 %v347_v2  ;;  %307 = vmatprep.subr.mxu1 %v347_v2  ;;  %v233_v27 = vld [vmem:[#allocation2] ss:$0 sm:$0xff]  ;;  %s224_s18 = sshll.u32 %s350_s3, 4  ;;  %s225_s18 = int_to_ptr.vmem [resolvable:$true] %s224_s18 }
  0x13   :  { %277 = vmatpush3.msra.mxu0 %v32_v14  ;;  %308 = vmatpush3.msra.mxu1 %v120_v24  ;;  %v232_v29 = vld [vmem:[%s493_s2] ss:$0 sm:$0xff]  ;;  %s325_s2 = scalar_lea.vmem %s225_s18, 32  ;;  %p330_p1 = scmp.lt.s32.totalorder %s225_s18, %s225_s18 }
  0x14   :  { %278 = vmatprep.subr.mxu0 %v347_v2  ;;  %309 = vmatprep.subr.mxu1 %v347_v2  ;;  %p326_p0 = scmp.ne.s32.totalorder %s225_s18, %s325_s2  ;;  %p331_p2 = scmp.lt.s32.totalorder %s325_s2, %s325_s2 }
  0x15   :  { %279 = vmatpush3.msra.mxu0 %v31_v15  ;;  %310 = vmatpush3.msra.mxu1 %v119_v25 }
  0x16   :  { %280 = vmatprep.subr.mxu0 %v347_v2  ;;  %311 = vmatprep.subr.mxu1 %v347_v2  ;;  %p332_p3 = por %p331_p2, %p330_p1 }
  0x17   :  { %281 = vmatpush3.msra.mxu0 %v30_v16  ;;  %312 = vmatpush3.msra.mxu1 %v118_v26 }
  0x18   :  { %282 = vmatprep.subr.mxu0 %v347_v2  ;;  %320 = vset.pattern.permute.xlu0 %v349_v28  ;;  %p333_p4 = pnand %p332_p3, %p326_p0 }
  0x19   :  { %283 = vmatpush3.msra.mxu0 %v29_v17  ;;  %133 = vperm.xlu0 %320, %v233_v27  }
  0x1a   :  { %284 = vmatprep.subr.mxu0 %v347_v2 }
  0x1b   :  { %285 = vmatpush3.msra.mxu0 %v28_v18 }
  0x1c   :  { %286 = vmatprep.subr.mxu0 %v347_v2 }
  0x1d   :  { %287 = vmatpush3.msra.mxu0 %v27_v19 }
  0x1e   :  { %288 = vmatprep.subr.mxu0 %v347_v2 }
  0x1f   :  { %289 = vmatpush3.msra.mxu0 %v26_v20 }
  0x20   :  { %290 = vmatprep.subr.mxu0 %v347_v2 }
  0x21   :  { %291 = vmatpush3.msra.mxu0 %v25_v21 }
  0x22   :  { %292 = vmatprep.subr.mxu0 %v347_v2 }
  0x23   :  { %293 = vmatpush3.msra.mxu0 %v24_v22 }
  0x24   :  { %295 = vmatmul.mubr.f32.vlgmr.msra.gmra.mxu0 %v23_v23 }
  0x94   :  { %v134_v34 = vpop.permute.xlu0 %133 }
  0xe4   :  { %v113_v30 = vpop.f32.mrf.mxu0 }
  0xe5   :  { %v114_v31 = vadd.f32 %v232_v29, %v113_v30 }
  0xe6   :  { %v296_v32 = vpop.f32.mrf.mxu0 }
  0xe7   :  { %v117_v33 = vmax.f32 %v114_v31, 0.0 }
  0xe9   :  { %314 = vmatmul.mubr.msk.f32.vlgmr.msra.gmra.mxu1 %vm136_vm1, %v117_v33 }
 0x1a9   :  { %v206_v35 = vpop.f32.mrf.mxu1 }
 0x1aa   :  { %v207_v36 = vadd.f32 %v206_v35, %v134_v34 }
 0x1ab   :  { %v315_v37 = vpop.f32.mrf.mxu1 }
 0x1ac   :  { %v235_v38 = vmul.f32 -1.442695, %v207_v36 }
 0x1ae   :  { %321 = vpow2.f32 %v235_v38 }
 0x1bb   :  { %v322_v39 = vpop.eup %321 }
 0x1bc   :  { %v213_v40 = vadd.f32 1.0, %v322_v39 }
 0x1be   :  { %323 = vrcp.f32 %v213_v40 }
 0x1cb   :  { %v324_v41 = vpop.eup %323 }
 0x1cc   :  { %217 = vst.msk [vmem:[#allocation3] sm:$0x3] %vm216_vm2, %v324_v41 }
 0x1cd   :  { %336 = shalt.err (!%p333_p4)
}
 0x1ce   :  { %227 = dma.vmem_to_hbm [thread:$0]  %s225_s18, 32, %s496_s5, [#allocation4]  }
 0x1cf   :  { %345 = dma.done.wait [#allocation4], 32  }
 0x1d0   :  { %346 = vsyncadd [#allocation4], 4294967264 }
 0x1d1   :  { %231 = vsyncpa [#allocation4], 1 }

</bundles_post_ra>
